<compile_context>
chip_gen: v7x
topology: tpu7x:2x2x1
jax: 0.10.0
libtpu: 0.0.40
codegen_flags: <defaults>
</compile_context>

<pallas_src>
import math

import jax
import jax.numpy as jnp
from jax.experimental import pallas as pl
from jax.experimental.pallas import tpu as pltpu

IN_FEATURES = 25088          # VGG features: 512 * 7 * 7
K_TILE = 3584                # 25088 = 7 * 3584 ; 3584 % 128 == 0
_MAX_BM = 256                # batch-tile rows (multiple of 8)
_MAX_NN = 512                # class-tile lanes (multiple of 128)


def _linear_kernel(x_ref, w_ref, b_ref, o_ref, acc_ref):
    # grid = (batch tiles, class tiles, K tiles); K (axis 2) is the reduction.
    @pl.when(pl.program_id(2) == 0)
    def _():
        acc_ref[...] = jnp.zeros_like(acc_ref)

    acc_ref[...] += jnp.dot(
        x_ref[...], w_ref[...], preferred_element_type=jnp.float32
    )

    @pl.when(pl.program_id(2) == pl.num_programs(2) - 1)
    def _():
        o_ref[...] = (acc_ref[...] + b_ref[...]).astype(o_ref.dtype)


def prepare_params(weight, bias):
    """One-time layout prep (hoisted out of the forward path).

    Args:
      weight: (numClass, 25088) f32, PyTorch nn.Linear layout.
      bias:   (numClass,) f32.
    Returns:
      w_pad: (25088, Np) bf16   (pre-transposed, lane-padded)
      b_pad: (1, Np) f32
      num_class: int
    """
    num_class = weight.shape[0]
    n_pad = max(128, pl.cdiv(num_class, 128) * 128)
    w_pad = jnp.zeros((IN_FEATURES, n_pad), jnp.bfloat16)
    w_pad = w_pad.at[:, :num_class].set(weight.T.astype(jnp.bfloat16))
    b_pad = jnp.zeros((1, n_pad), jnp.float32).at[0, :num_class].set(bias)
    return w_pad, b_pad, num_class


def vgg_fc_forward(x, w_pad, b_pad, num_class):
    """Forward pass of vggNetFC (Flatten + Linear(25088, numClass)).

    Args:
      x: (B, 512, 7, 7) or (B, 25088) float32 NCHW features.
      w_pad, b_pad: outputs of prepare_params().
    Returns:
      (B, numClass) float32 logits.
    """
    B = x.shape[0]
    x2d = x.reshape(B, -1).astype(jnp.bfloat16)   # == nn.Flatten on NCHW
    assert x2d.shape[1] == IN_FEATURES, f"expected {IN_FEATURES} features"
    n_pad = w_pad.shape[1]

    # Tile sizes: full-dim blocks for small B / numClass, otherwise aligned
    # tiles (partial trailing blocks are masked by Pallas; rows independent).
    bm = B if B <= _MAX_BM else _MAX_BM
    nn_t = n_pad if n_pad <= _MAX_NN else _MAX_NN
    grid = (pl.cdiv(B, bm), pl.cdiv(n_pad, nn_t), IN_FEATURES // K_TILE)

    cost = pl.CostEstimate(
        flops=2 * B * IN_FEATURES * num_class,
        transcendentals=0,
        bytes_accessed=(x2d.size * 2 + w_pad.size * 2
                        + b_pad.size * 4 + B * n_pad * 4),
    )

    out = pl.pallas_call(
        _linear_kernel,
        out_shape=jax.ShapeDtypeStruct((B, n_pad), jnp.float32),
        grid_spec=pltpu.PrefetchScalarGridSpec(
            num_scalar_prefetch=0,
            grid=grid,
            in_specs=[
                pl.BlockSpec((bm, K_TILE), lambda i, j, k: (i, k)),
                pl.BlockSpec((K_TILE, nn_t), lambda i, j, k: (k, j)),
                pl.BlockSpec((1, nn_t), lambda i, j, k: (0, j)),
            ],
            out_specs=pl.BlockSpec((bm, nn_t), lambda i, j, k: (i, j)),
            scratch_shapes=[pltpu.VMEM((bm, nn_t), jnp.float32)],
        ),
        compiler_params=pltpu.CompilerParams(
            dimension_semantics=("parallel", "parallel", "arbitrary"),
        ),
        cost_estimate=cost,
    )(x2d, w_pad, b_pad)

    return out[:, :num_class]


def init_params(key, num_class):
    """Deterministic PyTorch-style nn.Linear(25088, num_class) init."""
    kw, kb = jax.random.split(key)
    bound = 1.0 / math.sqrt(IN_FEATURES)
    weight = jax.random.uniform(
        kw, (num_class, IN_FEATURES), jnp.float32, minval=-bound, maxval=bound
    )
    bias = jax.random.uniform(
        kb, (num_class,), jnp.float32, minval=-bound, maxval=bound
    )
    return weight, bias


if __name__ == "__main__":
    key = jax.random.PRNGKey(0)
    k_x, k_p = jax.random.split(key)

    batch = 2
    num_class = 10

    # VGG backbone output features: NCHW (B, 512, 7, 7) -> 25088 flat.
    x = jax.random.normal(k_x, (batch, 512, 7, 7), jnp.float32)
    weight, bias = init_params(k_p, num_class)

    # One-time param layout prep (this is the "stored" parameterization).
    w_pad, b_pad, nc = prepare_params(weight, bias)

    y = vgg_fc_forward(x, w_pad, b_pad, nc)
    y = jax.block_until_ready(y)

    # Reference in plain JAX with the same bf16 input rounding + f32 accumulate.
    x2d = x.reshape(batch, -1)
    x_bf = x2d.astype(jnp.bfloat16).astype(jnp.float32)
    w_bf = weight.astype(jnp.bfloat16).astype(jnp.float32)
    y_ref = x_bf @ w_bf.T + bias

    assert y.shape == (batch, num_class)
    assert jnp.allclose(y, y_ref, atol=2e-3, rtol=2e-3)

    print("KERNEL_OK")
</pallas_src>

<mosaic_0001>
module attributes {stable_mosaic.version = 11 : i64} {
  func.func @_linear_kernel(%arg0: i32, %arg1: i32, %arg2: i32, %arg3: memref<2x3584xbf16, #tpu.memory_space<vmem>>, %arg4: memref<3584x128xbf16, #tpu.memory_space<vmem>>, %arg5: memref<1x128xf32, #tpu.memory_space<vmem>>, %arg6: memref<2x128xf32, #tpu.memory_space<vmem>>, %arg7: memref<2x128xf32, #tpu.memory_space<vmem>>) attributes {dimension_semantics = [#tpu.dimension_semantics<parallel>, #tpu.dimension_semantics<parallel>, #tpu.dimension_semantics<arbitrary>], iteration_bounds = array<i64: 1, 1, 7>, scalar_prefetch = 0 : i64, scratch_operands = 1 : i64, tpu.core_type = #tpu.core_type<tc>, window_params = [{transform_indices = @transform_0, window_bounds = array<i64: 2, 3584>}, {transform_indices = @transform_1, window_bounds = array<i64: 3584, 128>}, {transform_indices = @transform_2, window_bounds = array<i64: 1, 128>}, {transform_indices = @transform_3, window_bounds = array<i64: 2, 128>}]} {
    %c0_i32 = arith.constant 0 : i32
    %0 = arith.cmpi eq, %arg2, %c0_i32 : i32
    %1 = arith.extui %0 : i1 to i32
    %c0_i32_0 = arith.constant 0 : i32
    %2 = arith.cmpi ne, %1, %c0_i32_0 : i32
    scf.if %2 {
      %cst_9 = arith.constant 0.000000e+00 : f32
      %12 = vector.broadcast %cst_9 : f32 to vector<2x128xf32>
      %c0_10 = arith.constant 0 : index
      %c0_11 = arith.constant 0 : index
      %13 = vector.load %arg7[%c0_10, %c0_11] : memref<2x128xf32, #tpu.memory_space<vmem>>, vector<2x128xf32>
      tpu.vector_store %arg7[%c0_10, %c0_11], %12 {strides = array<i32>} : memref<2x128xf32, #tpu.memory_space<vmem>>, vector<2x128xf32>,
    } else {
    }
    %c0 = arith.constant 0 : index
    %c0_1 = arith.constant 0 : index
    %3 = vector.load %arg7[%c0, %c0_1] : memref<2x128xf32, #tpu.memory_space<vmem>>, vector<2x128xf32>
    %c0_2 = arith.constant 0 : index
    %c0_3 = arith.constant 0 : index
    %4 = vector.load %arg3[%c0_2, %c0_3] : memref<2x3584xbf16, #tpu.memory_space<vmem>>, vector<2x3584xbf16>
    %c0_4 = arith.constant 0 : index
    %c0_5 = arith.constant 0 : index
    %5 = vector.load %arg4[%c0_4, %c0_5] : memref<3584x128xbf16, #tpu.memory_space<vmem>>, vector<3584x128xbf16>
    %cst = arith.constant dense<0.000000e+00> : vector<2x128xf32>
    %6 = tpu.matmul %4, %5, %cst {dimension_numbers = #tpu.dot_dimension_numbers<[1], [0], [0], [1], [0, 0, 1, 1], [], []>} : vector<2x3584xbf16>, vector<3584x128xbf16>, vector<2x128xf32> -> vector<2x128xf32>
    %7 = arith.addf %3, %6 : vector<2x128xf32>
    %c0_6 = arith.constant 0 : index
    %c0_7 = arith.constant 0 : index
    %8 = vector.load %arg7[%c0_6, %c0_7] : memref<2x128xf32, #tpu.memory_space<vmem>>, vector<2x128xf32>
    tpu.vector_store %arg7[%c0_6, %c0_7], %7 {strides = array<i32>} : memref<2x128xf32, #tpu.memory_space<vmem>>, vector<2x128xf32>,
    %c6_i32 = arith.constant 6 : i32
    %9 = arith.cmpi eq, %arg2, %c6_i32 : i32
    %10 = arith.extui %9 : i1 to i32
    %c0_i32_8 = arith.constant 0 : i32
    %11 = arith.cmpi ne, %10, %c0_i32_8 : i32
    scf.if %11 {
      %c0_9 = arith.constant 0 : index
      %c0_10 = arith.constant 0 : index
      %12 = vector.load %arg7[%c0_9, %c0_10] : memref<2x128xf32, #tpu.memory_space<vmem>>, vector<2x128xf32>
      %c0_11 = arith.constant 0 : index
      %c0_12 = arith.constant 0 : index
      %13 = vector.load %arg5[%c0_11, %c0_12] : memref<1x128xf32, #tpu.memory_space<vmem>>, vector<1x128xf32>
      %14 = vector.broadcast %13 : vector<1x128xf32> to vector<2x128xf32>
      %15 = arith.addf %12, %14 : vector<2x128xf32>
      %c0_13 = arith.constant 0 : index
      %c0_14 = arith.constant 0 : index
      %16 = vector.load %arg6[%c0_13, %c0_14] : memref<2x128xf32, #tpu.memory_space<vmem>>, vector<2x128xf32>
      tpu.vector_store %arg6[%c0_13, %c0_14], %15 {strides = array<i32>} : memref<2x128xf32, #tpu.memory_space<vmem>>, vector<2x128xf32>,
    } else {
    }
    return
  }
  func.func @transform_0(%arg0: i32, %arg1: i32, %arg2: i32) -> (i32, i32) {
    %c0_i32 = arith.constant 0 : i32
    return %arg0, %arg2 : i32, i32
  }
  func.func @transform_1(%arg0: i32, %arg1: i32, %arg2: i32) -> (i32, i32) {
    %c0_i32 = arith.constant 0 : i32
    return %arg2, %arg1 : i32, i32
  }
  func.func @transform_2(%arg0: i32, %arg1: i32, %arg2: i32) -> (i32, i32) {
    %c0_i32 = arith.constant 0 : i32
    %c0_i32_0 = arith.constant 0 : i32
    return %c0_i32, %arg1 : i32, i32
  }
  func.func @transform_3(%arg0: i32, %arg1: i32, %arg2: i32) -> (i32, i32) {
    %c0_i32 = arith.constant 0 : i32
    return %arg0, %arg1 : i32, i32
  }
}

</mosaic_0001>

<bundles_post_ra>
// kernel: tpu_custom_call.1
= control target key start
LH: loop header
LB: loop body
LE: loop exit
PB: predicated region body
PF: predicated region fallthrough
CT: control target
= control target key end

     0   :  { %8 = vsyncpa [#allocation4], 0  ;;  %s4545_s0 = inlined_call_operand.hbm [shape: bf16[2,25088], index: 0, kind: input, shape index: {}]   ;;  %s4546_s1 = inlined_call_operand.hbm [shape: bf16[25088,128], index: 1, kind: input, shape index: {}]   ;;  %s4547_s2 = inlined_call_operand.hbm [shape: f32[1,128], index: 2, kind: input, shape index: {}]   ;;  %s4548_s3 = inlined_call_operand.hbm [shape: f32[2,128], index: 3, kind: output, shape index: {}]  }
   0x1   :  { %10 = vsyncpa [#allocation4 + $0x1], 0 }
   0x2   :  { %11 = vsyncpa [#allocation7], 0 }
   0x3   :  { %13 = vsyncpa [#allocation7 + $0x1], 0 }
   0x4   :  { %14 = vsyncpa [#allocation5], 0  ;;  %s4034_s12 = smov 0   ;;  %s4036_s13 = smov 0  }
   0x5   :  { %s4038_s14 = smov 0   ;;  %s4040_s15 = smov 0  }
   0x6   :  { %s4042_s16 = smov 0   ;;  %s4044_s17 = smov 0  }
   0x7 LB: > { %s4063_s18 = sadd.s32 4294967295, %s4004_s17   ;;  %s48_s19 = sadd.s32 1, %s3992_s14  ;;  %s4004_s17 = sphi %s4044_s17, %s20_s17   ;;  %s4000_s16 = sphi %s4042_s16, %s4569_s16   ;;  %s3996_s15 = sphi %s4040_s15, %s4568_s15   ;;  %s3992_s14 = sphi %s4038_s14, %s4567_s14   ;;  %s3988_s13 = sphi %s4036_s13, %s4566_s13   ;;  %s3984_s12 = sphi %s4034_s12, %s4565_s12  }
   0x8   : > { %p55_p0 = scmp.ne.s32.totalorder %s3992_s14, %s3988_s13  ;;  %p61_p1 = scmp.ne.s32.totalorder %s3988_s13, %s3984_s12 }
   0x9   : > { %p4549_p2 = scmp.eq.s32.totalorder %s4063_s18, 0  ;;  %p2966_p3 = scmp.ge.s32.totalorder %s4004_s17, 1 }
   0xa   : > { %p154_p4 = scmp.lt.s32.totalorder %s4004_s17, 8  ;;  %s4006_s22 = smov [#allocation8]  }
   0xb   : > { %p4074_p5 = por %p4549_p2, %p61_p1  ;;  %s169_s23 = sshll.u32 %s4006_s22, 4  ;;  %s170_s23 = int_to_ptr.vmem [resolvable:$true] %s169_s23 }
   0xc   : > { %p4078_p6 = pnand %p2966_p3, %p154_p4  ;;  %p56_p8 = scmp.eq.s32.totalorder %s4004_s17, 0 }
   0xd   : > { %s4552_s20 = scalar_select %p4074_p5, 1, 0 }
   0xe   : > { %s4553_s21 = scalar_select %p4078_p6, 1, 0 }
   0xf   : > { %p3531_p7 = pneg %p4078_p6  ;;  %s32_s25 = sadd.s32 1, %s4000_s16 }
  0x10   : > { %p4092_p10 = scmp.ge.s32.totalorder %s32_s25, 7  ;;  %p4099_p11 = por %p56_p8, %p55_p0 }
  0x11   : > { %p4087_p9 = pnand %p3531_p7, %p4549_p2  ;;  %s3828_s30 = scalar_lea.hbm %s4547_s2, 16 }
  0x12   : > { %s4555_s26 = scalar_select %p4092_p10, 1, 0 }
  0x13   : > { %s4556_s27 = scalar_select %p4099_p11, 1, 0 }
  0x14   : > { %p3829_p13 = scmp.ne.s32.totalorder %s4547_s2, %s3828_s30  ;;  %p3830_p1 = pneg %p4087_p9 }
  0x15   : > { %p3835_p0 = scmp.lt.u32.totalorder %s3828_s30, %s4547_s2 }
  0x16   : > { %p3831_p3 = pnand %p3830_p1, %p3829_p13 }
  0x18   : > { %p3832_p4 = pneg %p3831_p3 }
  0x1a   : > { %p3837_p7 = pnand %p3835_p0, %p3832_p4 }
  0x1c   : > { %3840 = shalt.err (!%p3837_p7)
}
  0x1d   : > { %s3841_s8 = scalar_lea.vmem %s170_s23, 16  ;;  %s3848_s9 = scalar_lea.vmem %s170_s23, 32 }
  0x1e   : > { %p3842_p8 = scmp.ne.s32.totalorder %s170_s23, %s3841_s8  ;;  %p3849_p5 = scmp.lt.s32.totalorder %s170_s23, %s170_s23 }
  0x1f   : > { %p3850_p6 = scmp.lt.s32.totalorder %s3848_s9, %s3841_s8 }
  0x20   : > { %p3844_p2 = pnand %p3842_p8, %p3830_p1 }
  0x21   : > { %p3851_p11 = por %p3850_p6, %p3849_p5 }
  0x22   : > { %p3845_p12 = pneg %p3844_p2 }
  0x24   : > { %p3852_p10 = pnand %p3851_p11, %p3845_p12 }
  0x26   : > { %3855 = shalt.err (!%p3852_p10)
}
  0x27   : > { %3534 = dma.hbm_to_vmem [thread:$0]  (!%p4087_p9), %s4547_s2, 16, %s170_s23, [#allocation7]  }
  0x28   : > { %p4557_p2 = scmp.ne.s32.totalorder %s4555_s26, 0  ;;  %s4125_s12 = sand.u32 1, %s3992_s14  }
  0x29   : > { %s3205_s22 = smul.u32 448, %s4000_s16  ;;  %p4558_p6 = scmp.ne.s32.totalorder %s4556_s27, 0 }
  0x2a   : > { %s4571_s25 = smov (%p4557_p2, %s32_s25), 0  ;;  %s3515_s28 = smul.u32 28, %s4125_s12 }
  0x2b   : > { %s44_s24 = ssub.s32 %s4000_s16, %s4571_s25  ;;  %s4134_s4 = scalar_lea.hbm %s4545_s0, %s3205_s22 }
  0x2c   : > { %p46_p5 = scmp.eq.s32.totalorder %s44_s24, 0  ;;  %p4559_p9 = scmp.lt.s32.totalorder %s4004_s17, 7 }
  0x2d   : > { %s184_s5 = scalar_lea.vmem [#allocation3], %s3515_s28  ;;  %s3516_s7 = smul.u32 1792, %s4125_s12 }
  0x2e   : > { %p4140_p10 = pnand %p4559_p9, %p4558_p6  ;;  %s194_s6 = sshll.u32 %s184_s5, 4  ;;  %s4150_s6 = int_to_ptr.vmem [resolvable:$true] %s194_s6 }
  0x2f   : > { %s4147_s26 = scalar_select %p46_p5, %s3992_s14, %s48_s19  }
  0x30   : > { %s3206_s27 = smul.u32 28672, %s4000_s16  ;;  %s181_s8 = scalar_lea.sflag [#allocation4], %s4125_s12 }
  0x31   : > { %s3856_s9 = scalar_lea.hbm %s4134_s4, 448  ;;  %p3858_p12 = pneg %p4140_p10 }
  0x32   : > { %p3857_p11 = scmp.ne.s32.totalorder %s4134_s4, %s3856_s9  ;;  %s3861_s19 = scalar_lea.hbm %s4545_s0, 3136 }
  0x33   : > { %p3862_p3 = scmp.lt.u32.totalorder %s4134_s4, %s4545_s0  ;;  %p3863_p4 = scmp.lt.u32.totalorder %s3861_s19, %s3856_s9 }
  0x34   : > { %p3859_p13 = pnand %p3858_p12, %p3857_p11  ;;  %p3865_p7 = scmp.lt.u32.totalorder %s3856_s9, %s4134_s4 }
  0x35   : > { %p3864_p0 = por %p3863_p4, %p3862_p3 }
  0x36   : > { %p3860_p1 = pneg %p3859_p13 }
  0x37   : > { %p3866_p8 = por %p3865_p7, %p3864_p0 }
  0x39   : > { %p3867_p2 = pnand %p3866_p8, %p3860_p1 }
  0x3b   : > { %3870 = shalt.err (!%p3867_p2)
}
  0x3c   : > { %s3871_s28 = scalar_lea.vmem %s4150_s6, 448  ;;  %s4007_s29 = smov [#allocation3]  }
  0x3d   : > { %p3872_p5 = scmp.ne.s32.totalorder %s4150_s6, %s3871_s28  ;;  %s3876_s30 = sshll.u32 %s4007_s29, 4  ;;  %s3877_s30 = int_to_ptr.vmem [resolvable:$false] %s3876_s30 }
  0x3e   : > { %s3878_s5 = scalar_lea.vmem %s3877_s30, 896  ;;  %p3879_p11 = scmp.lt.s32.totalorder %s4150_s6, %s3877_s30 }
  0x3f   : > { %p3874_p6 = pnand %p3872_p5, %p3858_p12  ;;  %p3880_p13 = scmp.lt.s32.totalorder %s3878_s5, %s3871_s28 }
  0x41   : > { %p3875_p9 = pneg %p3874_p6  ;;  %p3881_p3 = por %p3880_p13, %p3879_p11 }
  0x43   : > { %p3882_p4 = pnand %p3881_p3, %p3875_p9 }
  0x45   : > { %3885 = shalt.err (!%p3882_p4)
}
  0x46   : > { %3538 = dma.hbm_to_vmem [thread:$0]  (!%p4140_p10), %s4134_s4, 448, %s4150_s6, %s181_s8  }
  0x47   : > { %s201_s9 = sand.u32 1, %s4004_s17   ;;  %s205_s10 = scalar_lea.vmem [#allocation6], %s3516_s7 }
  0x48   : > { %s213_s11 = sshll.u32 %s205_s10, 4  ;;  %s4189_s24 = scalar_lea.hbm %s4546_s1, %s3206_s27  ;;  %s4182_s11 = int_to_ptr.vmem [resolvable:$true] %s213_s11 }
  0x49   : > { %s4191_s28 = scalar_lea.sflag [#allocation7], %s201_s9  ;;  %s3886_s29 = scalar_lea.hbm %s4189_s24, 28672 }
  0x4a   : > { %p3887_p1 = scmp.ne.s32.totalorder %s4189_s24, %s3886_s29  ;;  %s3891_s6 = scalar_lea.hbm %s4546_s1, 200704 }
  0x4b   : > { %p3892_p8 = scmp.lt.u32.totalorder %s4189_s24, %s4546_s1  ;;  %p3893_p2 = scmp.lt.u32.totalorder %s3891_s6, %s3886_s29 }
  0x4c   : > { %p3889_p0 = pnand %p3887_p1, %p3858_p12  ;;  %p3895_p6 = scmp.lt.u32.totalorder %s3886_s29, %s4189_s24 }
  0x4d   : > { %p3894_p5 = por %p3893_p2, %p3892_p8 }
  0x4e   : > { %p3890_p7 = pneg %p3889_p0 }
  0x4f   : > { %p3896_p9 = por %p3895_p6, %p3894_p5 }
  0x51   : > { %p3897_p11 = pnand %p3896_p9, %p3890_p7 }
  0x53   : > { %3900 = shalt.err (!%p3897_p11)
}
  0x54   : > { %s3901_s27 = scalar_lea.vmem %s4182_s11, 28672  ;;  %s4008_s30 = smov [#allocation6]  }
  0x55   : > { %p3902_p13 = scmp.ne.s32.totalorder %s4182_s11, %s3901_s27  ;;  %s3906_s5 = sshll.u32 %s4008_s30, 4  ;;  %s3907_s5 = int_to_ptr.vmem [resolvable:$false] %s3906_s5 }
  0x56   : > { %s3908_s9 = scalar_lea.vmem %s3907_s5, 57344  ;;  %p3909_p1 = scmp.lt.s32.totalorder %s4182_s11, %s3907_s5 }
  0x57   : > { %p3904_p3 = pnand %p3902_p13, %p3858_p12  ;;  %p3910_p0 = scmp.lt.s32.totalorder %s3908_s9, %s3901_s27 }
  0x59   : > { %p3905_p4 = pneg %p3904_p3  ;;  %p3911_p8 = por %p3910_p0, %p3909_p1 }
  0x5b   : > { %p3912_p2 = pnand %p3911_p8, %p3905_p4 }
  0x5d   : > { %3915 = shalt.err (!%p3912_p2)
}
  0x5e   : > { %s4009_s10 = smov 64   ;;  %s4010_s19 = smov 4  }
  0x5f   : > { %3541 = dma.hbm_to_vmem [thread:$0]  (!%p4140_p10), %s4189_s24, 28672, %s4182_s11, %s4191_s28, %s4009_s10, %s4009_s10, %s4010_s19  }
  0x60   : > { %p4561_p12 = scmp.ne.s32.totalorder %s4553_s21, 0 }
  0x61   : > { %s227_s22 = sand.u32 (!%p4561_p12), 1, %s3988_s13   ;;  %p4562_p7 = scmp.ne.s32.totalorder (!%p4561_p12), %s4552_s20, 0 }
  0x62   : > { %225 = sbr.rel (%p4561_p12) target bundleno = 605 (0x25d), region = 32  ;;  %s228_s12 = scalar_lea.sflag (!%p4561_p12), [#allocation4], %s227_s22 }
  0x63   : > { %s3517_s29 = smul.u32 (!%p4561_p12), 28, %s227_s22 }
  0x65   : > { %s4220_s4 = scalar_lea.vmem (!%p4561_p12), [#allocation3], %s3517_s29 }
  0x69   : > { %3967 = dma.done.wait (%p4562_p7), %s228_s12, 448  }
  0x6a   : > { %3969 = vsyncadd (%p4562_p7), %s228_s12, 4294966848  ;;  %s236_s6 = sand.u32 1, %s4063_s18   ;;  %s3518_s23 = smul.u32 1792, %s227_s22 }
  0x6b   : > { %s237_s11 = scalar_lea.sflag [#allocation7], %s236_s6 }
  0x6c   : > { %s4227_s24 = scalar_lea.vmem [#allocation6], %s3518_s23 }
  0x6d   : > { %3971 = dma.done.wait (%p4562_p7), %s237_s11, 28672  }
  0x6e   : > { %3973 = vsyncadd (%p4562_p7), %s237_s11, 4294938624  ;;  %p4563_p10 = scmp.eq.s32.totalorder %s4063_s18, 0 }
  0x70   : > { %3975 = dma.done.wait (%p4563_p10), [#allocation7], 16   ;;  %p4564_p5 = pmov %p4563_p10 }
  0x71   : > { %p2973_p6 = scmp.ne.s32.totalorder %s3996_s15, 0 }
  0x72   : > { %3977 = vsyncadd (%p4564_p5), [#allocation7], 4294967280  ;;  %v4011_v0 = vmov (!%p2973_p6), 0.0  }
  0x73   : > { %273 = sbr.rel (%p2973_p6) target bundleno = 122 (0x7a), region = 48  ;;  %274 = vst [vmem:[#allocation2] sm:$0x3] (!%p2973_p6), %v4011_v0 }
  0x7a PF: > { %v3601_v1 = vld [vmem:[%s4227_s24 + $0x40] sm:$0xff]   ;;  %v3605_v5 = vld [vmem:[%s4227_s24 + $0x48] sm:$0xff]   ;;  %v3609_v9 = vld [vmem:[%s4227_s24 + $0x50] sm:$0xff]   ;;  %v736_v29 = vlaneseq  ;;  %v4012_v37 = vmov 1966171168   ;;  %p3199_p9 = scmp.ne.s32.totalorder %s3996_s15, 6 }
  0x7b   : > { %v3602_v2 = vld [vmem:[%s4227_s24 + $0xc0] sm:$0xff]   ;;  %3207 = vmatprep.subr.bf16.mxu0 %v3601_v1  ;;  %v3606_v6 = vld [vmem:[%s4227_s24 + $0xc8] sm:$0xff]   ;;  %v3610_v10 = vld [vmem:[%s4227_s24 + $0xd0] sm:$0xff]   ;;  %v734_v38 = vunpack.c.l.s4 %v4012_v37 }
  0x7c   : > { %v3603_v3 = vld [vmem:[%s4227_s24] sm:$0xff]   ;;  %3229 = vmatprep.subr.bf16.mxu1 %v3602_v2  ;;  %v3607_v7 = vld [vmem:[%s4227_s24 + $0x8] sm:$0xff]   ;;  %v3611_v11 = vld [vmem:[%s4227_s24 + $0x10] sm:$0xff]   ;;  %v737_v34 = vshrl.u32 %v736_v29, 7 }
  0x7d   : > { %v3604_v4 = vld [vmem:[%s4227_s24 + $0x80] sm:$0xff]   ;;  %3208 = vmatpush3.bf16.msra.mxu0 %v3603_v3  ;;  %v3608_v8 = vld [vmem:[%s4227_s24 + $0x88] sm:$0xff]   ;;  %v3612_v12 = vld [vmem:[%s4227_s24 + $0x90] sm:$0xff]   ;;  %v735_v41 = vunpack.c.0.s8 %v734_v38 }
  0x7e   : > { %3230 = vmatpush3.bf16.msra.mxu1 %v3604_v4  ;;  %3209 = vmatprep.subr.bf16.mxu0 %v3605_v5  ;;  %v3613_v13 = vld [vmem:[%s4227_s24 + $0x58] sm:$0xff]   ;;  %v3617_v17 = vld [vmem:[%s4227_s24 + $0x60] sm:$0xff]   ;;  %v3621_v21 = vld [vmem:[%s4227_s24 + $0x68] sm:$0xff]  }
  0x7f   : > { %3231 = vmatprep.subr.bf16.mxu1 %v3606_v6  ;;  %v3614_v14 = vld [vmem:[%s4227_s24 + $0xd8] sm:$0xff]   ;;  %v3618_v18 = vld [vmem:[%s4227_s24 + $0xe0] sm:$0xff]   ;;  %v3622_v22 = vld [vmem:[%s4227_s24 + $0xe8] sm:$0xff]   ;;  %v4273_v42 = vsub.s32 %v735_v41, %v737_v34 }
  0x80   : > { %v3615_v15 = vld [vmem:[%s4227_s24 + $0x18] sm:$0xff]   ;;  %v3619_v19 = vld [vmem:[%s4227_s24 + $0x20] sm:$0xff]   ;;  %v3623_v23 = vld [vmem:[%s4227_s24 + $0x28] sm:$0xff]  }
  0x81   : > { %3210 = vmatpush3.bf16.msra.mxu0 %v3607_v7  ;;  %v3616_v16 = vld [vmem:[%s4227_s24 + $0x98] sm:$0xff]   ;;  %v3620_v20 = vld [vmem:[%s4227_s24 + $0xa0] sm:$0xff]   ;;  %v3624_v24 = vld [vmem:[%s4227_s24 + $0xa8] sm:$0xff]  }
  0x82   : > { %3232 = vmatpush3.bf16.msra.mxu1 %v3608_v8  ;;  %3211 = vmatprep.subr.bf16.mxu0 %v3609_v9  ;;  %v3625_v25 = vld [vmem:[%s4227_s24 + $0x70] sm:$0xff]   ;;  %v3629_v30 = vld [vmem:[%s4227_s24 + $0x78] sm:$0xff]   ;;  %v276_v35 = vld [vmem:[%s4220_s4] sm:$0xff] }
  0x83   : > { %3233 = vmatprep.subr.bf16.mxu1 %v3610_v10  ;;  %v3626_v26 = vld [vmem:[%s4227_s24 + $0xf0] sm:$0xff]   ;;  %v3630_v31 = vld [vmem:[%s4227_s24 + $0xf8] sm:$0xff]   ;;  %v3634_v36 = vld [vmem:[%s4227_s24 + $0x140] sm:$0xff]   ;;  %v732_v40 = vcombine.high %v276_v35, %v276_v35  ;;  %v739_v43 = vrot.slane %v276_v35, %v4273_v42 }
  0x84   : > { %v3627_v27 = vld [vmem:[%s4227_s24 + $0x30] sm:$0xff]   ;;  %v3631_v32 = vld [vmem:[%s4227_s24 + $0x38] sm:$0xff]   ;;  %v3635_v39 = vld [vmem:[%s4227_s24 + $0x1c0] sm:$0xff]  }
  0x85   : > { %3212 = vmatpush3.bf16.msra.mxu0 %v3611_v11  ;;  %v3628_v28 = vld [vmem:[%s4227_s24 + $0xb0] sm:$0xff]   ;;  %v3632_v33 = vld [vmem:[%s4227_s24 + $0xb8] sm:$0xff]   ;;  %v4277_v44 = vrot.slane %v732_v40, %v4273_v42  ;;  %v747_v45 = vcombine.high %v739_v43, %v739_v43  ;;  %v755_v46 = vrot.slane %v739_v43, %v4273_v42  ;;  %v3636_v49 = vld [vmem:[%s4227_s24 + $0x100] sm:$0xff]  }
  0x86   : > { %3234 = vmatpush3.bf16.msra.mxu1 %v3612_v12  ;;  %3213 = vmatprep.subr.bf16.mxu0 %v3613_v13  ;;  %v3638_v52 = vld [vmem:[%s4227_s24 + $0x148] sm:$0xff]   ;;  %v3637_v54 = vld [vmem:[%s4227_s24 + $0x180] sm:$0xff]   ;;  %v3642_v58 = vld [vmem:[%s4227_s24 + $0x150] sm:$0xff]  }
  0x87   : > { %3235 = vmatprep.subr.bf16.mxu1 %v3614_v14  ;;  %v748_v47 = vcombine.high %v4277_v44, %v4277_v44  ;;  %v769_v48 = vrot.slane %v747_v45, %v4273_v42  ;;  %v777_v51 = vcombine.high %v755_v46, %v755_v46  ;;  %v3639_v55 = vld [vmem:[%s4227_s24 + $0x1c8] sm:$0xff]   ;;  %v3643_v60 = vld [vmem:[%s4227_s24 + $0x1d0] sm:$0xff]   ;;  %v3646_v62 = vld [vmem:[%s4227_s24 + $0x158] sm:$0xff]  }
  0x88   : > { %v3640_v57 = vld [vmem:[%s4227_s24 + $0x108] sm:$0xff]   ;;  %v3644_v61 = vld [vmem:[%s4227_s24 + $0x110] sm:$0xff]   ;;  %v3647_v0 = vld [vmem:[%s4227_s24 + $0x1d8] sm:$0xff]  }
  0x89   : > { %3214 = vmatpush3.bf16.msra.mxu0 %v3615_v15  ;;  %v776_v50 = vrot.slane %v748_v47, %v4273_v42  ;;  %2307 = vmatprep.mubr.bf16.mxu0 %v769_v48  ;;  %v779_v53 = vcombine.high %v769_v48, %v769_v48  ;;  %v3641_v59 = vld [vmem:[%s4227_s24 + $0x188] sm:$0xff]   ;;  %v3645_v63 = vld [vmem:[%s4227_s24 + $0x190] sm:$0xff]   ;;  %v3648_v1 = vld [vmem:[%s4227_s24 + $0x118] sm:$0xff]  }
  0x8a   : > { %3236 = vmatpush3.bf16.msra.mxu1 %v3616_v16  ;;  %3215 = vmatprep.subr.bf16.mxu0 %v3617_v17  ;;  %v3650_v2 = vld [vmem:[%s4227_s24 + $0x160] sm:$0xff]   ;;  %v3649_v3 = vld [vmem:[%s4227_s24 + $0x198] sm:$0xff]   ;;  %v3654_v6 = vld [vmem:[%s4227_s24 + $0x168] sm:$0xff]  }
  0x8b   : > { %3237 = vmatprep.subr.bf16.mxu1 %v3618_v18  ;;  %v780_v56 = vcombine.high %v776_v50, %v776_v50  ;;  %2347 = vmatprep.mubr.bf16.mxu1 %v779_v53  ;;  %v3651_v4 = vld [vmem:[%s4227_s24 + $0x1e0] sm:$0xff]   ;;  %v3655_v8 = vld [vmem:[%s4227_s24 + $0x1e8] sm:$0xff]   ;;  %v3658_v10 = vld [vmem:[%s4227_s24 + $0x170] sm:$0xff]   ;;  %v762_v18 = vrot.slane %v4277_v44, %v4273_v42 }
  0x8c   : > { %v3652_v5 = vld [vmem:[%s4227_s24 + $0x120] sm:$0xff]   ;;  %v3656_v9 = vld [vmem:[%s4227_s24 + $0x128] sm:$0xff]   ;;  %v3659_v12 = vld [vmem:[%s4227_s24 + $0x1f0] sm:$0xff]  }
  0x8d   : > { %3216 = vmatpush3.bf16.msra.mxu0 %v3619_v19  ;;  %v3653_v7 = vld [vmem:[%s4227_s24 + $0x1a0] sm:$0xff]   ;;  %v3657_v11 = vld [vmem:[%s4227_s24 + $0x1a8] sm:$0xff]   ;;  %v3660_v13 = vld [vmem:[%s4227_s24 + $0x130] sm:$0xff]  }
  0x8e   : > { %3238 = vmatpush3.bf16.msra.mxu1 %v3620_v20  ;;  %3217 = vmatprep.subr.bf16.mxu0 %v3621_v21  ;;  %v3662_v14 = vld [vmem:[%s4227_s24 + $0x178] sm:$0xff]   ;;  %v3661_v15 = vld [vmem:[%s4227_s24 + $0x1b0] sm:$0xff]   ;;  %v3666_v19 = vld [vmem:[%s4227_s24 + $0x240] sm:$0xff]  }
  0x8f   : > { %3239 = vmatprep.subr.bf16.mxu1 %v3622_v22  ;;  %v3663_v16 = vld [vmem:[%s4227_s24 + $0x1f8] sm:$0xff]   ;;  %v3667_v21 = vld [vmem:[%s4227_s24 + $0x2c0] sm:$0xff]   ;;  %v3673_v29 = vld [vmem:[%s4227_s24 + $0x288] sm:$0xff]  }
  0x90   : > { %v3664_v17 = vld [vmem:[%s4227_s24 + $0x138] sm:$0xff]   ;;  %v3668_v22 = vld [vmem:[%s4227_s24 + $0x200] sm:$0xff]   ;;  %v3686_v40 = vld [vmem:[%s4227_s24 + $0x268] sm:$0xff]  }
  0x91   : > { %3218 = vmatpush3.bf16.msra.mxu0 %v3623_v23  ;;  %v3665_v20 = vld [vmem:[%s4227_s24 + $0x1b8] sm:$0xff]   ;;  %v778_v23 = vcombine.high %v762_v18, %v762_v18  ;;  %v3683_v38 = vld [vmem:[%s4227_s24 + $0x2e0] sm:$0xff]   ;;  %v3687_v43 = vld [vmem:[%s4227_s24 + $0x2e8] sm:$0xff]  }
  0x92   : > { %3240 = vmatpush3.bf16.msra.mxu1 %v3624_v24  ;;  %3219 = vmatprep.subr.bf16.mxu0 %v3625_v25  ;;  %v3670_v24 = vld [vmem:[%s4227_s24 + $0x248] sm:$0xff]   ;;  %v3669_v25 = vld [vmem:[%s4227_s24 + $0x280] sm:$0xff]   ;;  %v3679_v34 = vld [vmem:[%s4227_s24 + $0x2d8] sm:$0xff]  }
  0x93   : > { %3241 = vmatprep.subr.bf16.mxu1 %v3626_v26  ;;  %v3671_v26 = vld [vmem:[%s4227_s24 + $0x2c8] sm:$0xff]   ;;  %v3680_v35 = vld [vmem:[%s4227_s24 + $0x218] sm:$0xff]   ;;  %v3685_v41 = vld [vmem:[%s4227_s24 + $0x2a0] sm:$0xff]  }
  0x94   : > { %v3681_v37 = vld [vmem:[%s4227_s24 + $0x298] sm:$0xff]   ;;  %v3688_v44 = vld [vmem:[%s4227_s24 + $0x228] sm:$0xff]   ;;  %v3690_v45 = vld [vmem:[%s4227_s24 + $0x270] sm:$0xff]  }
  0x95   : > { %3220 = vmatpush3.bf16.msra.mxu0 %v3627_v27  ;;  %v3672_v27 = vld [vmem:[%s4227_s24 + $0x208] sm:$0xff]  }
  0x96   : > { %3242 = vmatpush3.bf16.msra.mxu1 %v3628_v28  ;;  %3221 = vmatprep.subr.bf16.mxu0 %v3629_v30  ;;  %v3674_v28 = vld [vmem:[%s4227_s24 + $0x250] sm:$0xff]   ;;  %v3689_v47 = vld [vmem:[%s4227_s24 + $0x2a8] sm:$0xff]  }
  0x97   : > { %3243 = vmatprep.subr.bf16.mxu1 %v3630_v31  ;;  %v3675_v30 = vld [vmem:[%s4227_s24 + $0x2d0] sm:$0xff]  }
  0x98   : > { %v3676_v31 = vld [vmem:[%s4227_s24 + $0x210] sm:$0xff]  }
  0x99   : > { %3222 = vmatpush3.bf16.msra.mxu0 %v3631_v32  ;;  %v3678_v32 = vld [vmem:[%s4227_s24 + $0x258] sm:$0xff]  }
  0x9a   : > { %3244 = vmatpush3.bf16.msra.mxu1 %v3632_v33  ;;  %3251 = vmatprep.subr.bf16.mxu0 %v3634_v36  ;;  %v3677_v33 = vld [vmem:[%s4227_s24 + $0x290] sm:$0xff]   ;;  %v3682_v36 = vld [vmem:[%s4227_s24 + $0x260] sm:$0xff]  }
  0x9b   : > { %3273 = vmatprep.subr.bf16.mxu1 %v3635_v39  ;;  %v3684_v39 = vld [vmem:[%s4227_s24 + $0x220] sm:$0xff]  }
  0x9c   : > { %2308 = vmatmul.mubr.bf16.vlgmr.msra.gmra.mrb[0].mxu0 %v755_v46  ;;  %v277_v46 = vld [vmem:[%s4220_s4 + $0x8] sm:$0xff] }
  0x9d   : > { %3252 = vmatpush3.bf16.msra.mxu0 %v3636_v49  ;;  %2348 = vmatmul.mubr.bf16.vlgmr.msra.gmra.mrb[0].mxu1 %v777_v51  ;;  %v788_v48 = vrot.slane %v277_v46, %v4273_v42  ;;  %v781_v49 = vcombine.high %v277_v46, %v277_v46  ;;  %v3692_v51 = vld [vmem:[%s4227_s24 + $0x230] sm:$0xff]  }
  0x9e   : > { %3253 = vmatprep.subr.bf16.mxu0 %v3638_v52  ;;  %3274 = vmatpush3.bf16.msra.mxu1 %v3637_v54  ;;  %v3694_v54 = vld [vmem:[%s4227_s24 + $0x278] sm:$0xff]   ;;  %v3740_v46 = vld [vmem:[%s4227_s24 + $0x4d0] sm:$0xff]  }
  0x9f   : > { %2387 = vmatprep.mubr.bf16.mxu0 %v776_v50  ;;  %3275 = vmatprep.subr.bf16.mxu1 %v3639_v55  ;;  %v3691_v50 = vld [vmem:[%s4227_s24 + $0x2f0] sm:$0xff]   ;;  %v796_v52 = vcombine.high %v788_v48, %v788_v48  ;;  %v4346_v53 = vrot.slane %v781_v49, %v4273_v42 }
  0xa0   : > { %2427 = vmatprep.mubr.bf16.mxu1 %v780_v56  ;;  %v3693_v55 = vld [vmem:[%s4227_s24 + $0x2b0] sm:$0xff]  }
  0xa1   : > { %3254 = vmatpush3.bf16.msra.mxu0 %v3640_v57  ;;  %v818_v56 = vrot.slane %v796_v52, %v4273_v42  ;;  %v797_v57 = vcombine.high %v4346_v53, %v4346_v53  ;;  %v3742_v49 = vld [vmem:[%s4227_s24 + $0x490] sm:$0xff]   ;;  %v3747_v52 = vld [vmem:[%s4227_s24 + $0x460] sm:$0xff]  }
  0xa2   : > { %3255 = vmatprep.subr.bf16.mxu0 %v3642_v58  ;;  %3276 = vmatpush3.bf16.msra.mxu1 %v3641_v59  ;;  %v3695_v58 = vld [vmem:[%s4227_s24 + $0x2f8] sm:$0xff]  }
  0xa3   : > { %3277 = vmatprep.subr.bf16.mxu1 %v3643_v60  ;;  %v3696_v59 = vld [vmem:[%s4227_s24 + $0x238] sm:$0xff]   ;;  %v828_v60 = vcombine.high %v818_v56, %v818_v56 }
  0xa5   : > { %3256 = vmatpush3.bf16.msra.mxu0 %v3644_v61  ;;  %v804_v61 = vrot.slane %v788_v48, %v4273_v42  ;;  %v3743_v48 = vld [vmem:[%s4227_s24 + $0x458] sm:$0xff]  }
  0xa6   : > { %3257 = vmatprep.subr.bf16.mxu0 %v3646_v62  ;;  %3278 = vmatpush3.bf16.msra.mxu1 %v3645_v63  ;;  %v3698_v62 = vld [vmem:[%s4227_s24 + $0x340] sm:$0xff]   ;;  %v3697_v63 = vld [vmem:[%s4227_s24 + $0x2b8] sm:$0xff]  }
  0xa7   : > { %3279 = vmatprep.subr.bf16.mxu1 %v3647_v0  ;;  %v825_v0 = vrot.slane %v797_v57, %v4273_v42  ;;  %v3750_v57 = vld [vmem:[%s4227_s24 + $0x4a0] sm:$0xff]  }
  0xa9   : > { %3258 = vmatpush3.bf16.msra.mxu0 %v3648_v1  ;;  %v3699_v1 = vld [vmem:[%s4227_s24 + $0x3c0] sm:$0xff]  }
  0xaa   : > { %3259 = vmatprep.subr.bf16.mxu0 %v3650_v2  ;;  %3280 = vmatpush3.bf16.msra.mxu1 %v3649_v3  ;;  %v3700_v2 = vld [vmem:[%s4227_s24 + $0x300] sm:$0xff]   ;;  %v826_v3 = vcombine.high %v804_v61, %v804_v61 }
  0xab   : > { %3281 = vmatprep.subr.bf16.mxu1 %v3651_v4  ;;  %v3702_v4 = vld [vmem:[%s4227_s24 + $0x348] sm:$0xff]  }
  0xad   : > { %3260 = vmatpush3.bf16.msra.mxu0 %v3652_v5  ;;  %v3701_v5 = vld [vmem:[%s4227_s24 + $0x380] sm:$0xff]  }
  0xae   : > { %3261 = vmatprep.subr.bf16.mxu0 %v3654_v6  ;;  %3282 = vmatpush3.bf16.msra.mxu1 %v3653_v7  ;;  %v829_v6 = vcombine.high %v825_v0, %v825_v0  ;;  %v3703_v7 = vld [vmem:[%s4227_s24 + $0x3c8] sm:$0xff]  }
  0xaf   : > { %3283 = vmatprep.subr.bf16.mxu1 %v3655_v8  ;;  %v3704_v8 = vld [vmem:[%s4227_s24 + $0x308] sm:$0xff]  }
  0xb1   : > { %3262 = vmatpush3.bf16.msra.mxu0 %v3656_v9  ;;  %v3706_v9 = vld [vmem:[%s4227_s24 + $0x350] sm:$0xff]  }
  0xb2   : > { %3263 = vmatprep.subr.bf16.mxu0 %v3658_v10  ;;  %3284 = vmatpush3.bf16.msra.mxu1 %v3657_v11  ;;  %v3705_v10 = vld [vmem:[%s4227_s24 + $0x388] sm:$0xff]   ;;  %v3707_v11 = vld [vmem:[%s4227_s24 + $0x3d0] sm:$0xff]  }
  0xb3   : > { %3285 = vmatprep.subr.bf16.mxu1 %v3659_v12  ;;  %v3708_v12 = vld [vmem:[%s4227_s24 + $0x310] sm:$0xff]  }
  0xb5   : > { %3264 = vmatpush3.bf16.msra.mxu0 %v3660_v13  ;;  %v3710_v13 = vld [vmem:[%s4227_s24 + $0x358] sm:$0xff]  }
  0xb6   : > { %3265 = vmatprep.subr.bf16.mxu0 %v3662_v14  ;;  %3286 = vmatpush3.bf16.msra.mxu1 %v3661_v15  ;;  %v3709_v14 = vld [vmem:[%s4227_s24 + $0x390] sm:$0xff]   ;;  %v3711_v15 = vld [vmem:[%s4227_s24 + $0x3d8] sm:$0xff]  }
  0xb7   : > { %3287 = vmatprep.subr.bf16.mxu1 %v3663_v16  ;;  %v3712_v16 = vld [vmem:[%s4227_s24 + $0x318] sm:$0xff]  }
  0xb9   : > { %3266 = vmatpush3.bf16.msra.mxu0 %v3664_v17  ;;  %v3714_v17 = vld [vmem:[%s4227_s24 + $0x360] sm:$0xff]  }
  0xba   : > { %3295 = vmatprep.subr.bf16.mxu0 %v3666_v19  ;;  %3288 = vmatpush3.bf16.msra.mxu1 %v3665_v20  ;;  %v3715_v19 = vld [vmem:[%s4227_s24 + $0x3e0] sm:$0xff]  }
  0xbb   : > { %3317 = vmatprep.subr.bf16.mxu1 %v3667_v21  ;;  %v3716_v20 = vld [vmem:[%s4227_s24 + $0x320] sm:$0xff]   ;;  %v3718_v21 = vld [vmem:[%s4227_s24 + $0x368] sm:$0xff]  }
  0xbc   : > { %2388 = vmatmul.mubr.bf16.vlgmr.msra.gmra.mrb[4].mxu0 %v762_v18  ;;  %v3713_v18 = vld [vmem:[%s4227_s24 + $0x398] sm:$0xff]  }
  0xbd   : > { %3296 = vmatpush3.bf16.msra.mxu0 %v3668_v22  ;;  %2428 = vmatmul.mubr.bf16.vlgmr.msra.gmra.mrb[4].mxu1 %v778_v23  ;;  %v3717_v22 = vld [vmem:[%s4227_s24 + $0x3a0] sm:$0xff]   ;;  %v3719_v23 = vld [vmem:[%s4227_s24 + $0x3e8] sm:$0xff]  }
  0xbe   : > { %3297 = vmatprep.subr.bf16.mxu0 %v3670_v24  ;;  %3318 = vmatpush3.bf16.msra.mxu1 %v3669_v25  ;;  %v3720_v24 = vld [vmem:[%s4227_s24 + $0x328] sm:$0xff]   ;;  %v3722_v25 = vld [vmem:[%s4227_s24 + $0x370] sm:$0xff]  }
  0xbf   : > { %3319 = vmatprep.subr.bf16.mxu1 %v3671_v26  ;;  %2467 = vmatprep.mubr.bf16.mxu0 %v818_v56  ;;  %v3721_v26 = vld [vmem:[%s4227_s24 + $0x3a8] sm:$0xff]  }
  0xc0   : > { %2507 = vmatprep.mubr.bf16.mxu1 %v828_v60  ;;  %v3751_v56 = vld [vmem:[%s4227_s24 + $0x468] sm:$0xff]   ;;  %v3755_v60 = vld [vmem:[%s4227_s24 + $0x470] sm:$0xff]  }
  0xc1   : > { %3298 = vmatpush3.bf16.msra.mxu0 %v3672_v27  ;;  %v3723_v27 = vld [vmem:[%s4227_s24 + $0x3f0] sm:$0xff]  }
  0xc2   : > { %3299 = vmatprep.subr.bf16.mxu0 %v3674_v28  ;;  %3320 = vmatpush3.bf16.msra.mxu1 %v3673_v29  ;;  %v3724_v28 = vld [vmem:[%s4227_s24 + $0x330] sm:$0xff]   ;;  %v3726_v29 = vld [vmem:[%s4227_s24 + $0x378] sm:$0xff]  }
  0xc3   : > { %3321 = vmatprep.subr.bf16.mxu1 %v3675_v30  ;;  %v3725_v30 = vld [vmem:[%s4227_s24 + $0x3b0] sm:$0xff]  }
  0xc5   : > { %3300 = vmatpush3.bf16.msra.mxu0 %v3676_v31  ;;  %v3727_v31 = vld [vmem:[%s4227_s24 + $0x3f8] sm:$0xff]  }
  0xc6   : > { %3301 = vmatprep.subr.bf16.mxu0 %v3678_v32  ;;  %3322 = vmatpush3.bf16.msra.mxu1 %v3677_v33  ;;  %v3728_v32 = vld [vmem:[%s4227_s24 + $0x338] sm:$0xff]   ;;  %v811_v33 = vrot.slane %v4346_v53, %v4273_v42 }
  0xc7   : > { %3323 = vmatprep.subr.bf16.mxu1 %v3679_v34  ;;  %v3731_v34 = vld [vmem:[%s4227_s24 + $0x440] sm:$0xff]   ;;  %v3746_v53 = vld [vmem:[%s4227_s24 + $0x498] sm:$0xff]  }
  0xc9   : > { %3302 = vmatpush3.bf16.msra.mxu0 %v3680_v35  ;;  %v3729_v35 = vld [vmem:[%s4227_s24 + $0x3b8] sm:$0xff]  }
  0xca   : > { %3303 = vmatprep.subr.bf16.mxu0 %v3682_v36  ;;  %3324 = vmatpush3.bf16.msra.mxu1 %v3681_v37  ;;  %v3732_v36 = vld [vmem:[%s4227_s24 + $0x4c0] sm:$0xff]  }
  0xcb   : > { %3325 = vmatprep.subr.bf16.mxu1 %v3683_v38  ;;  %v3733_v37 = vld [vmem:[%s4227_s24 + $0x400] sm:$0xff]   ;;  %v827_v38 = vcombine.high %v811_v33, %v811_v33 }
  0xcd   : > { %3304 = vmatpush3.bf16.msra.mxu0 %v3684_v39  ;;  %v3735_v39 = vld [vmem:[%s4227_s24 + $0x448] sm:$0xff]  }
  0xce   : > { %3305 = vmatprep.subr.bf16.mxu0 %v3686_v40  ;;  %3326 = vmatpush3.bf16.msra.mxu1 %v3685_v41  ;;  %v3734_v40 = vld [vmem:[%s4227_s24 + $0x480] sm:$0xff]   ;;  %v3736_v41 = vld [vmem:[%s4227_s24 + $0x4c8] sm:$0xff]  }
  0xcf   : > { %3327 = vmatprep.subr.bf16.mxu1 %v3687_v43  ;;  %v3737_v43 = vld [vmem:[%s4227_s24 + $0x408] sm:$0xff]  }
  0xd1   : > { %3306 = vmatpush3.bf16.msra.mxu0 %v3688_v44  ;;  %v3739_v44 = vld [vmem:[%s4227_s24 + $0x450] sm:$0xff]  }
  0xd2   : > { %3307 = vmatprep.subr.bf16.mxu0 %v3690_v45  ;;  %3328 = vmatpush3.bf16.msra.mxu1 %v3689_v47  ;;  %v3738_v45 = vld [vmem:[%s4227_s24 + $0x488] sm:$0xff]   ;;  %v3741_v47 = vld [vmem:[%s4227_s24 + $0x410] sm:$0xff]  }
  0xd3   : > { %3329 = vmatprep.subr.bf16.mxu1 %v3691_v50  ;;  %v3744_v50 = vld [vmem:[%s4227_s24 + $0x4d8] sm:$0xff]  }
  0xd5   : > { %3308 = vmatpush3.bf16.msra.mxu0 %v3692_v51  ;;  %v3745_v51 = vld [vmem:[%s4227_s24 + $0x418] sm:$0xff]  }
  0xd6   : > { %3309 = vmatprep.subr.bf16.mxu0 %v3694_v54  ;;  %3330 = vmatpush3.bf16.msra.mxu1 %v3693_v55  ;;  %v3748_v54 = vld [vmem:[%s4227_s24 + $0x4e0] sm:$0xff]  }
  0xd7   : > { %3331 = vmatprep.subr.bf16.mxu1 %v3695_v58  ;;  %v3749_v55 = vld [vmem:[%s4227_s24 + $0x420] sm:$0xff]   ;;  %v3752_v58 = vld [vmem:[%s4227_s24 + $0x4e8] sm:$0xff]  }
  0xd9   : > { %3310 = vmatpush3.bf16.msra.mxu0 %v3696_v59  ;;  %v3753_v59 = vld [vmem:[%s4227_s24 + $0x428] sm:$0xff]  }
  0xda   : > { %3339 = vmatprep.subr.bf16.mxu0 %v3698_v62  ;;  %3332 = vmatpush3.bf16.msra.mxu1 %v3697_v63  ;;  %v3754_v62 = vld [vmem:[%s4227_s24 + $0x4a8] sm:$0xff]  }
  0xdb   : > { %3361 = vmatprep.subr.bf16.mxu1 %v3699_v1  ;;  %v3756_v1 = vld [vmem:[%s4227_s24 + $0x4f0] sm:$0xff]  }
  0xdc   : > { %2468 = vmatmul.mubr.bf16.vlgmr.msra.gmra.mrb[8].mxu0 %v804_v61  ;;  %v278_v61 = vld [vmem:[%s4220_s4 + $0x10] sm:$0xff] }
  0xdd   : > { %3340 = vmatpush3.bf16.msra.mxu0 %v3700_v2  ;;  %2547 = vmatprep.mubr.bf16.mxu0 %v825_v0  ;;  %v837_v63 = vrot.slane %v278_v61, %v4273_v42  ;;  %v830_v0 = vcombine.high %v278_v61, %v278_v61  ;;  %v3757_v2 = vld [vmem:[%s4227_s24 + $0x430] sm:$0xff]  }
  0xde   : > { %2508 = vmatmul.mubr.bf16.vlgmr.msra.gmra.mrb[8].mxu1 %v826_v3  ;;  %3341 = vmatprep.subr.bf16.mxu0 %v3702_v4  ;;  %v3805_v61 = vld [vmem:[%s4227_s24 + $0x6d0] sm:$0xff]  }
  0xdf   : > { %3362 = vmatpush3.bf16.msra.mxu1 %v3701_v5  ;;  %2587 = vmatprep.mubr.bf16.mxu1 %v829_v6  ;;  %v845_v3 = vcombine.high %v837_v63, %v837_v63  ;;  %v4422_v4 = vrot.slane %v830_v0, %v4273_v42  ;;  %v3759_v5 = vld [vmem:[%s4227_s24 + $0x478] sm:$0xff]   ;;  %v3758_v6 = vld [vmem:[%s4227_s24 + $0x4b0] sm:$0xff]  }
  0xe0   : > { %3363 = vmatprep.subr.bf16.mxu1 %v3703_v7  ;;  %v3807_v0 = vld [vmem:[%s4227_s24 + $0x690] sm:$0xff]  }
  0xe1   : > { %3342 = vmatpush3.bf16.msra.mxu0 %v3704_v8  ;;  %v867_v7 = vrot.slane %v845_v3, %v4273_v42  ;;  %v846_v8 = vcombine.high %v4422_v4, %v4422_v4  ;;  %v3812_v3 = vld [vmem:[%s4227_s24 + $0x660] sm:$0xff]  }
  0xe2   : > { %3343 = vmatprep.subr.bf16.mxu0 %v3706_v9  ;;  %v3760_v9 = vld [vmem:[%s4227_s24 + $0x4f8] sm:$0xff]  }
  0xe3   : > { %3364 = vmatpush3.bf16.msra.mxu1 %v3705_v10  ;;  %v3761_v10 = vld [vmem:[%s4227_s24 + $0x438] sm:$0xff]  }
  0xe4   : > { %3365 = vmatprep.subr.bf16.mxu1 %v3707_v11  ;;  %v877_v11 = vcombine.high %v867_v7, %v867_v7 }
  0xe5   : > { %3344 = vmatpush3.bf16.msra.mxu0 %v3708_v12  ;;  %v853_v12 = vrot.slane %v837_v63, %v4273_v42  ;;  %v3808_v63 = vld [vmem:[%s4227_s24 + $0x658] sm:$0xff]  }
  0xe6   : > { %3345 = vmatprep.subr.bf16.mxu0 %v3710_v13  ;;  %v3763_v13 = vld [vmem:[%s4227_s24 + $0x540] sm:$0xff]  }
  0xe7   : > { %3366 = vmatpush3.bf16.msra.mxu1 %v3709_v14  ;;  %v3762_v14 = vld [vmem:[%s4227_s24 + $0x4b8] sm:$0xff]  }
  0xe8   : > { %3367 = vmatprep.subr.bf16.mxu1 %v3711_v15  ;;  %v874_v15 = vrot.slane %v846_v8, %v4273_v42  ;;  %v3815_v8 = vld [vmem:[%s4227_s24 + $0x6a0] sm:$0xff]  }
  0xe9   : > { %3346 = vmatpush3.bf16.msra.mxu0 %v3712_v16  ;;  %v3764_v16 = vld [vmem:[%s4227_s24 + $0x5c0] sm:$0xff]  }
  0xea   : > { %3347 = vmatprep.subr.bf16.mxu0 %v3714_v17  ;;  %v3765_v17 = vld [vmem:[%s4227_s24 + $0x500] sm:$0xff]  }
  0xeb   : > { %3368 = vmatpush3.bf16.msra.mxu1 %v3713_v18  ;;  %v875_v18 = vcombine.high %v853_v12, %v853_v12 }
  0xec   : > { %3369 = vmatprep.subr.bf16.mxu1 %v3715_v19  ;;  %v3767_v19 = vld [vmem:[%s4227_s24 + $0x548] sm:$0xff]  }
  0xed   : > { %3348 = vmatpush3.bf16.msra.mxu0 %v3716_v20  ;;  %v3766_v20 = vld [vmem:[%s4227_s24 + $0x580] sm:$0xff]  }
  0xee   : > { %3349 = vmatprep.subr.bf16.mxu0 %v3718_v21  ;;  %v878_v21 = vcombine.high %v874_v15, %v874_v15 }
  0xef   : > { %3370 = vmatpush3.bf16.msra.mxu1 %v3717_v22  ;;  %v3768_v22 = vld [vmem:[%s4227_s24 + $0x5c8] sm:$0xff]  }
  0xf0   : > { %3371 = vmatprep.subr.bf16.mxu1 %v3719_v23  ;;  %v3769_v23 = vld [vmem:[%s4227_s24 + $0x508] sm:$0xff]  }
  0xf1   : > { %3350 = vmatpush3.bf16.msra.mxu0 %v3720_v24  ;;  %v3771_v24 = vld [vmem:[%s4227_s24 + $0x550] sm:$0xff]  }
  0xf2   : > { %3351 = vmatprep.subr.bf16.mxu0 %v3722_v25  ;;  %v3770_v25 = vld [vmem:[%s4227_s24 + $0x588] sm:$0xff]  }
  0xf3   : > { %3372 = vmatpush3.bf16.msra.mxu1 %v3721_v26  ;;  %v3772_v26 = vld [vmem:[%s4227_s24 + $0x5d0] sm:$0xff]  }
  0xf4   : > { %3373 = vmatprep.subr.bf16.mxu1 %v3723_v27  ;;  %v3773_v27 = vld [vmem:[%s4227_s24 + $0x510] sm:$0xff]  }
  0xf5   : > { %3352 = vmatpush3.bf16.msra.mxu0 %v3724_v28  ;;  %v3775_v28 = vld [vmem:[%s4227_s24 + $0x558] sm:$0xff]  }
  0xf6   : > { %3353 = vmatprep.subr.bf16.mxu0 %v3726_v29  ;;  %v3774_v29 = vld [vmem:[%s4227_s24 + $0x590] sm:$0xff]  }
  0xf7   : > { %3374 = vmatpush3.bf16.msra.mxu1 %v3725_v30  ;;  %v3776_v30 = vld [vmem:[%s4227_s24 + $0x5d8] sm:$0xff]  }
  0xf8   : > { %3375 = vmatprep.subr.bf16.mxu1 %v3727_v31  ;;  %v3777_v31 = vld [vmem:[%s4227_s24 + $0x518] sm:$0xff]  }
  0xf9   : > { %3354 = vmatpush3.bf16.msra.mxu0 %v3728_v32  ;;  %v3779_v32 = vld [vmem:[%s4227_s24 + $0x560] sm:$0xff]  }
  0xfa   : > { %3383 = vmatprep.subr.bf16.mxu0 %v3731_v34  ;;  %v3780_v34 = vld [vmem:[%s4227_s24 + $0x5e0] sm:$0xff]  }
  0xfb   : > { %3376 = vmatpush3.bf16.msra.mxu1 %v3729_v35  ;;  %v3781_v35 = vld [vmem:[%s4227_s24 + $0x520] sm:$0xff]  }
  0xfc   : > { %2548 = vmatmul.mubr.bf16.vlgmr.msra.gmra.mrb[12].mxu0 %v811_v33  ;;  %3405 = vmatprep.subr.bf16.mxu1 %v3732_v36  ;;  %v3778_v33 = vld [vmem:[%s4227_s24 + $0x598] sm:$0xff]   ;;  %v3783_v36 = vld [vmem:[%s4227_s24 + $0x568] sm:$0xff]  }
  0xfd   : > { %3384 = vmatpush3.bf16.msra.mxu0 %v3733_v37  ;;  %2627 = vmatprep.mubr.bf16.mxu0 %v867_v7  ;;  %v3782_v37 = vld [vmem:[%s4227_s24 + $0x5a0] sm:$0xff]   ;;  %v3816_v7 = vld [vmem:[%s4227_s24 + $0x668] sm:$0xff]  }
  0xfe   : > { %2588 = vmatmul.mubr.bf16.vlgmr.msra.gmra.mrb[12].mxu1 %v827_v38  ;;  %3385 = vmatprep.subr.bf16.mxu0 %v3735_v39  ;;  %v3784_v38 = vld [vmem:[%s4227_s24 + $0x5e8] sm:$0xff]  }
  0xff   : > { %3406 = vmatpush3.bf16.msra.mxu1 %v3734_v40  ;;  %2667 = vmatprep.mubr.bf16.mxu1 %v877_v11  ;;  %v3785_v39 = vld [vmem:[%s4227_s24 + $0x528] sm:$0xff]   ;;  %v3787_v40 = vld [vmem:[%s4227_s24 + $0x570] sm:$0xff]  }
 0x100   : > { %3407 = vmatprep.subr.bf16.mxu1 %v3736_v41  ;;  %v3786_v41 = vld [vmem:[%s4227_s24 + $0x5a8] sm:$0xff]   ;;  %v3820_v11 = vld [vmem:[%s4227_s24 + $0x670] sm:$0xff]  }
 0x101   : > { %3386 = vmatpush3.bf16.msra.mxu0 %v3737_v43  ;;  %v3788_v43 = vld [vmem:[%s4227_s24 + $0x5f0] sm:$0xff]  }
 0x102   : > { %3387 = vmatprep.subr.bf16.mxu0 %v3739_v44  ;;  %v3789_v44 = vld [vmem:[%s4227_s24 + $0x530] sm:$0xff]  }
 0x103   : > { %3408 = vmatpush3.bf16.msra.mxu1 %v3738_v45  ;;  %v3791_v45 = vld [vmem:[%s4227_s24 + $0x578] sm:$0xff]  }
 0x104   : > { %3409 = vmatprep.subr.bf16.mxu1 %v3740_v46  ;;  %v3790_v46 = vld [vmem:[%s4227_s24 + $0x5b0] sm:$0xff]  }
 0x105   : > { %3388 = vmatpush3.bf16.msra.mxu0 %v3741_v47  ;;  %v3792_v47 = vld [vmem:[%s4227_s24 + $0x5f8] sm:$0xff]  }
 0x106   : > { %3389 = vmatprep.subr.bf16.mxu0 %v3743_v48  ;;  %v3793_v48 = vld [vmem:[%s4227_s24 + $0x538] sm:$0xff]  }
 0x107   : > { %3410 = vmatpush3.bf16.msra.mxu1 %v3742_v49  ;;  %v860_v49 = vrot.slane %v4422_v4, %v4273_v42  ;;  %v3811_v4 = vld [vmem:[%s4227_s24 + $0x698] sm:$0xff]  }
 0x108   : > { %3411 = vmatprep.subr.bf16.mxu1 %v3744_v50  ;;  %v3796_v50 = vld [vmem:[%s4227_s24 + $0x640] sm:$0xff]  }
 0x109   : > { %3390 = vmatpush3.bf16.msra.mxu0 %v3745_v51  ;;  %v3794_v51 = vld [vmem:[%s4227_s24 + $0x5b8] sm:$0xff]  }
 0x10a   : > { %3391 = vmatprep.subr.bf16.mxu0 %v3747_v52  ;;  %v3797_v52 = vld [vmem:[%s4227_s24 + $0x6c0] sm:$0xff]  }
 0x10b   : > { %3412 = vmatpush3.bf16.msra.mxu1 %v3746_v53  ;;  %v3798_v53 = vld [vmem:[%s4227_s24 + $0x600] sm:$0xff]  }
 0x10c   : > { %3413 = vmatprep.subr.bf16.mxu1 %v3748_v54  ;;  %v876_v54 = vcombine.high %v860_v49, %v860_v49 }
 0x10d   : > { %3392 = vmatpush3.bf16.msra.mxu0 %v3749_v55  ;;  %v3800_v55 = vld [vmem:[%s4227_s24 + $0x648] sm:$0xff]  }
 0x10e   : > { %3393 = vmatprep.subr.bf16.mxu0 %v3751_v56  ;;  %v3799_v56 = vld [vmem:[%s4227_s24 + $0x680] sm:$0xff]  }
 0x10f   : > { %3414 = vmatpush3.bf16.msra.mxu1 %v3750_v57  ;;  %v3801_v57 = vld [vmem:[%s4227_s24 + $0x6c8] sm:$0xff]  }
 0x110   : > { %3415 = vmatprep.subr.bf16.mxu1 %v3752_v58  ;;  %v3802_v58 = vld [vmem:[%s4227_s24 + $0x608] sm:$0xff]  }
 0x111   : > { %3394 = vmatpush3.bf16.msra.mxu0 %v3753_v59  ;;  %v3804_v59 = vld [vmem:[%s4227_s24 + $0x650] sm:$0xff]  }
 0x112   : > { %3395 = vmatprep.subr.bf16.mxu0 %v3755_v60  ;;  %v3803_v60 = vld [vmem:[%s4227_s24 + $0x688] sm:$0xff]  }
 0x113   : > { %3416 = vmatpush3.bf16.msra.mxu1 %v3754_v62  ;;  %v3806_v62 = vld [vmem:[%s4227_s24 + $0x610] sm:$0xff]  }
 0x114   : > { %3417 = vmatprep.subr.bf16.mxu1 %v3756_v1  ;;  %v3809_v1 = vld [vmem:[%s4227_s24 + $0x6d8] sm:$0xff]  }
 0x115   : > { %3396 = vmatpush3.bf16.msra.mxu0 %v3757_v2  ;;  %v3810_v2 = vld [vmem:[%s4227_s24 + $0x618] sm:$0xff]  }
 0x116   : > { %3397 = vmatprep.subr.bf16.mxu0 %v3759_v5  ;;  %v3813_v5 = vld [vmem:[%s4227_s24 + $0x6e0] sm:$0xff]  }
 0x117   : > { %3418 = vmatpush3.bf16.msra.mxu1 %v3758_v6  ;;  %v3814_v6 = vld [vmem:[%s4227_s24 + $0x620] sm:$0xff]  }
 0x118   : > { %3419 = vmatprep.subr.bf16.mxu1 %v3760_v9  ;;  %v3817_v9 = vld [vmem:[%s4227_s24 + $0x6e8] sm:$0xff]  }
 0x119   : > { %3398 = vmatpush3.bf16.msra.mxu0 %v3761_v10  ;;  %v3818_v10 = vld [vmem:[%s4227_s24 + $0x628] sm:$0xff]  }
 0x11a   : > { %3427 = vmatprep.subr.bf16.mxu0 %v3763_v13  ;;  %v2974_v13 = vld.sshfl [vmem:[%s4220_s4 + $0x18] sm:$0x33 pattern:$0x75316420] }
 0x11b   : > { %3420 = vmatpush3.bf16.msra.mxu1 %v3762_v14  ;;  %v3821_v14 = vld [vmem:[%s4227_s24 + $0x6f0] sm:$0xff]  }
 0x11c   : > { %2628 = vmatmul.mubr.bf16.vlgmr.msra.gmra.mrb[16].mxu0 %v853_v12  ;;  %3449 = vmatprep.subr.bf16.mxu1 %v3764_v16  ;;  %v3819_v12 = vld [vmem:[%s4227_s24 + $0x6a8] sm:$0xff]   ;;  %v3822_v16 = vld [vmem:[%s4227_s24 + $0x630] sm:$0xff]  }
 0x11d   : > { %3428 = vmatpush3.bf16.msra.mxu0 %v3765_v17  ;;  %2707 = vmatprep.mubr.bf16.mxu0 %v874_v15  ;;  %v886_v15 = vcombine.high %v2974_v13, %v2974_v13  ;;  %v3824_v17 = vld [vmem:[%s4227_s24 + $0x678] sm:$0xff]  }
 0x11e   : > { %2668 = vmatmul.mubr.bf16.vlgmr.msra.gmra.mrb[16].mxu1 %v875_v18  ;;  %3429 = vmatprep.subr.bf16.mxu0 %v3767_v19  ;;  %v3823_v19 = vld [vmem:[%s4227_s24 + $0x6b0] sm:$0xff]  }
 0x11f   : > { %3450 = vmatpush3.bf16.msra.mxu1 %v3766_v20  ;;  %2747 = vmatprep.mubr.bf16.mxu1 %v878_v21  ;;  %v900_v18 = vrot.slane %v886_v15, %v4273_v42  ;;  %v3825_v20 = vld [vmem:[%s4227_s24 + $0x6f8] sm:$0xff]  }
 0x120   : > { %3451 = vmatprep.subr.bf16.mxu1 %v3768_v22  ;;  %v3826_v22 = vld [vmem:[%s4227_s24 + $0x638] sm:$0xff]  }
 0x121   : > { %3430 = vmatpush3.bf16.msra.mxu0 %v3769_v23  ;;  %v902_v21 = vcombine.high %v900_v18, %v900_v18  ;;  %v893_v23 = vrot.slane %v2974_v13, %v4273_v42 }
 0x122   : > { %3431 = vmatprep.subr.bf16.mxu0 %v3771_v24  ;;  %v3827_v24 = vld [vmem:[%s4227_s24 + $0x6b8] sm:$0xff]  }
 0x123   : > { %3452 = vmatpush3.bf16.msra.mxu1 %v3770_v25  ;;  %v901_v25 = vcombine.high %v893_v23, %v893_v23 }
 0x124   : > { %3453 = vmatprep.subr.bf16.mxu1 %v3772_v26 }
 0x125   : > { %3432 = vmatpush3.bf16.msra.mxu0 %v3773_v27 }
 0x126   : > { %3433 = vmatprep.subr.bf16.mxu0 %v3775_v28 }
 0x127   : > { %3454 = vmatpush3.bf16.msra.mxu1 %v3774_v29 }
 0x128   : > { %3455 = vmatprep.subr.bf16.mxu1 %v3776_v30 }
 0x129   : > { %3434 = vmatpush3.bf16.msra.mxu0 %v3777_v31 }
 0x12a   : > { %3435 = vmatprep.subr.bf16.mxu0 %v3779_v32 }
 0x12b   : > { %3456 = vmatpush3.bf16.msra.mxu1 %v3778_v33 }
 0x12c   : > { %3457 = vmatprep.subr.bf16.mxu1 %v3780_v34 }
 0x12d   : > { %3436 = vmatpush3.bf16.msra.mxu0 %v3781_v35 }
 0x12e   : > { %3437 = vmatprep.subr.bf16.mxu0 %v3783_v36 }
 0x12f   : > { %3458 = vmatpush3.bf16.msra.mxu1 %v3782_v37 }
 0x130   : > { %3459 = vmatprep.subr.bf16.mxu1 %v3784_v38 }
 0x131   : > { %3438 = vmatpush3.bf16.msra.mxu0 %v3785_v39 }
 0x132   : > { %3439 = vmatprep.subr.bf16.mxu0 %v3787_v40 }
 0x133   : > { %3460 = vmatpush3.bf16.msra.mxu1 %v3786_v41 }
 0x134   : > { %3461 = vmatprep.subr.bf16.mxu1 %v3788_v43 }
 0x135   : > { %3440 = vmatpush3.bf16.msra.mxu0 %v3789_v44 }
 0x136   : > { %3441 = vmatprep.subr.bf16.mxu0 %v3791_v45 }
 0x137   : > { %3462 = vmatpush3.bf16.msra.mxu1 %v3790_v46 }
 0x138   : > { %3463 = vmatprep.subr.bf16.mxu1 %v3792_v47 }
 0x139   : > { %3442 = vmatpush3.bf16.msra.mxu0 %v3793_v48 }
 0x13a   : > { %3471 = vmatprep.subr.bf16.mxu0 %v3796_v50 }
 0x13b   : > { %3464 = vmatpush3.bf16.msra.mxu1 %v3794_v51 }
 0x13c   : > { %2708 = vmatmul.mubr.bf16.vlgmr.msra.gmra.mrb[20].mxu0 %v860_v49  ;;  %3493 = vmatprep.subr.bf16.mxu1 %v3797_v52 }
 0x13d   : > { %3472 = vmatpush3.bf16.msra.mxu0 %v3798_v53  ;;  %2787 = vmatprep.mubr.bf16.mxu0 %v900_v18 }
 0x13e   : > { %2748 = vmatmul.mubr.bf16.vlgmr.msra.gmra.mrb[20].mxu1 %v876_v54  ;;  %3473 = vmatprep.subr.bf16.mxu0 %v3800_v55 }
 0x13f   : > { %3494 = vmatpush3.bf16.msra.mxu1 %v3799_v56  ;;  %2827 = vmatprep.mubr.bf16.mxu1 %v902_v21 }
 0x140   : > { %3495 = vmatprep.subr.bf16.mxu1 %v3801_v57 }
 0x141   : > { %3474 = vmatpush3.bf16.msra.mxu0 %v3802_v58 }
 0x142   : > { %3475 = vmatprep.subr.bf16.mxu0 %v3804_v59 }
 0x143   : > { %3496 = vmatpush3.bf16.msra.mxu1 %v3803_v60 }
 0x144   : > { %3497 = vmatprep.subr.bf16.mxu1 %v3805_v61 }
 0x145   : > { %3476 = vmatpush3.bf16.msra.mxu0 %v3806_v62 }
 0x146   : > { %3477 = vmatprep.subr.bf16.mxu0 %v3808_v63 }
 0x147   : > { %3498 = vmatpush3.bf16.msra.mxu1 %v3807_v0 }
 0x148   : > { %3499 = vmatprep.subr.bf16.mxu1 %v3809_v1 }
 0x149   : > { %3478 = vmatpush3.bf16.msra.mxu0 %v3810_v2 }
 0x14a   : > { %3479 = vmatprep.subr.bf16.mxu0 %v3812_v3 }
 0x14b   : > { %3500 = vmatpush3.bf16.msra.mxu1 %v3811_v4 }
 0x14c   : > { %3501 = vmatprep.subr.bf16.mxu1 %v3813_v5 }
 0x14d   : > { %3480 = vmatpush3.bf16.msra.mxu0 %v3814_v6 }
 0x14e   : > { %3481 = vmatprep.subr.bf16.mxu0 %v3816_v7 }
 0x14f   : > { %3502 = vmatpush3.bf16.msra.mxu1 %v3815_v8 }
 0x150   : > { %3503 = vmatprep.subr.bf16.mxu1 %v3817_v9 }
 0x151   : > { %3482 = vmatpush3.bf16.msra.mxu0 %v3818_v10 }
 0x152   : > { %3483 = vmatprep.subr.bf16.mxu0 %v3820_v11 }
 0x153   : > { %3504 = vmatpush3.bf16.msra.mxu1 %v3819_v12 }
 0x154   : > { %3505 = vmatprep.subr.bf16.mxu1 %v3821_v14 }
 0x155   : > { %3484 = vmatpush3.bf16.msra.mxu0 %v3822_v16 }
 0x156   : > { %3485 = vmatprep.subr.bf16.mxu0 %v3824_v17 }
 0x157   : > { %3506 = vmatpush3.bf16.msra.mxu1 %v3823_v19 }
 0x158   : > { %3507 = vmatprep.subr.bf16.mxu1 %v3825_v20 }
 0x159   : > { %3486 = vmatpush3.bf16.msra.mxu0 %v3826_v22 }
 0x15b   : > { %3508 = vmatpush3.bf16.msra.mxu1 %v3827_v24 }
 0x15c   : > { %2788 = vmatmul.mubr.bf16.vlgmr.msra.gmra.mrb[24].mxu0 %v893_v23 }
 0x15e   : > { %2828 = vmatmul.mubr.bf16.vlgmr.msra.gmra.mrb[24].mxu1 %v901_v25 }
 0x16f   : > { %v3223_v26 = vpop.f32.mrb[0].mxu0 }
 0x170   : > { %v3224_v27 = vpop.f32.mrb[1].mxu0  ;;  %v3245_v28 = vpop.f32.mrb[0].mxu1 }
 0x171   : > { %v3225_v29 = vadd.f32 %v3224_v27, %v3223_v26  ;;  %v3226_v30 = vpop.f32.mrb[2].mxu0  ;;  %v3246_v31 = vpop.f32.mrb[1].mxu1 }
 0x172   : > { %v3227_v32 = vpop.f32.mrb[3].mxu0  ;;  %v3247_v33 = vadd.f32 %v3246_v31, %v3245_v28  ;;  %v3248_v34 = vpop.f32.mrb[2].mxu1 }
 0x173   : > { %v3249_v35 = vpop.f32.mrb[3].mxu1 }
 0x174   : > { %v2350_v36 = vadd.f32 %v3247_v33, %v3225_v29 }
 0x18f   : > { %v3267_v42 = vpop.f32.mrb[4].mxu0 }
 0x190   : > { %v3268_v37 = vpop.f32.mrb[5].mxu0  ;;  %v3289_v38 = vpop.f32.mrb[4].mxu1 }
 0x191   : > { %v3269_v39 = vadd.f32 %v3268_v37, %v3267_v42  ;;  %v3270_v40 = vpop.f32.mrb[6].mxu0  ;;  %v3290_v41 = vpop.f32.mrb[5].mxu1 }
 0x192   : > { %v3271_v43 = vpop.f32.mrb[7].mxu0  ;;  %v3291_v45 = vadd.f32 %v3290_v41, %v3289_v38  ;;  %v3292_v46 = vpop.f32.mrb[6].mxu1 }
 0x193   : > { %v2390_v44 = vadd.f32 %v3269_v39, %v2350_v36  ;;  %v3293_v47 = vpop.f32.mrb[7].mxu1  ;;  %v275_v43 = vld [vmem:[#allocation2] sm:$0x3] }
 0x195   : > { %v2430_v48 = vadd.f32 %v3291_v45, %v2390_v44 }
 0x1af   : > { %v3311_v49 = vpop.f32.mrb[8].mxu0 }
 0x1b0   : > { %v3312_v50 = vpop.f32.mrb[9].mxu0 }
 0x1b1   : > { %v3333_v51 = vpop.f32.mrb[8].mxu1  ;;  %v3313_v52 = vadd.f32 %v3312_v50, %v3311_v49  ;;  %v3314_v53 = vpop.f32.mrb[10].mxu0 }
 0x1b2   : > { %v3334_v54 = vpop.f32.mrb[9].mxu1  ;;  %v3315_v55 = vpop.f32.mrb[11].mxu0 }
 0x1b3   : > { %v2470_v56 = vadd.f32 %v3313_v52, %v2430_v48  ;;  %v3335_v57 = vadd.f32 %v3334_v54, %v3333_v51  ;;  %v3336_v58 = vpop.f32.mrb[10].mxu1  ;;  %v3200_v48 = vld [vmem:[#allocation8] ss:$0 sm:$0xff] (!%p3199_p9) }
 0x1b4   : > { %v3337_v59 = vpop.f32.mrb[11].mxu1 }
 0x1b5   : > { %v2510_v60 = vadd.f32 %v3335_v57, %v2470_v56 }
 0x1cf   : > { %v3355_v61 = vpop.f32.mrb[12].mxu0 }
 0x1d0   : > { %v3356_v62 = vpop.f32.mrb[13].mxu0 }
 0x1d1   : > { %v3377_v63 = vpop.f32.mrb[12].mxu1  ;;  %v3357_v0 = vadd.f32 %v3356_v62, %v3355_v61  ;;  %v3358_v1 = vpop.f32.mrb[14].mxu0 }
 0x1d2   : > { %v3378_v2 = vpop.f32.mrb[13].mxu1  ;;  %v3359_v3 = vpop.f32.mrb[15].mxu0 }
 0x1d3   : > { %v2550_v4 = vadd.f32 %v3357_v0, %v2510_v60  ;;  %v3379_v5 = vadd.f32 %v3378_v2, %v3377_v63  ;;  %v3380_v6 = vpop.f32.mrb[14].mxu1 }
 0x1d4   : > { %v3381_v7 = vpop.f32.mrb[15].mxu1 }
 0x1d5   : > { %v2590_v8 = vadd.f32 %v3379_v5, %v2550_v4 }
 0x1ef   : > { %v3399_v9 = vpop.f32.mrb[16].mxu0 }
 0x1f0   : > { %v3400_v10 = vpop.f32.mrb[17].mxu0 }
 0x1f1   : > { %v3421_v11 = vpop.f32.mrb[16].mxu1  ;;  %v3401_v12 = vadd.f32 %v3400_v10, %v3399_v9  ;;  %v3402_v13 = vpop.f32.mrb[18].mxu0 }
 0x1f2   : > { %v3422_v14 = vpop.f32.mrb[17].mxu1  ;;  %v3403_v15 = vpop.f32.mrb[19].mxu0 }
 0x1f3   : > { %v2630_v16 = vadd.f32 %v3401_v12, %v2590_v8  ;;  %v3423_v17 = vadd.f32 %v3422_v14, %v3421_v11  ;;  %v3424_v18 = vpop.f32.mrb[18].mxu1 }
 0x1f4   : > { %v3425_v19 = vpop.f32.mrb[19].mxu1 }
 0x1f5   : > { %v2670_v20 = vadd.f32 %v3423_v17, %v2630_v16 }
 0x20f   : > { %v3443_v21 = vpop.f32.mrb[20].mxu0 }
 0x210   : > { %v3444_v22 = vpop.f32.mrb[21].mxu0 }
 0x211   : > { %v3465_v23 = vpop.f32.mrb[20].mxu1  ;;  %v3445_v24 = vadd.f32 %v3444_v22, %v3443_v21  ;;  %v3446_v25 = vpop.f32.mrb[22].mxu0 }
 0x212   : > { %v3466_v26 = vpop.f32.mrb[21].mxu1  ;;  %v3447_v27 = vpop.f32.mrb[23].mxu0 }
 0x213   : > { %v2710_v28 = vadd.f32 %v3445_v24, %v2670_v20  ;;  %v3467_v29 = vadd.f32 %v3466_v26, %v3465_v23  ;;  %v3468_v30 = vpop.f32.mrb[22].mxu1 }
 0x214   : > { %v3469_v31 = vpop.f32.mrb[23].mxu1 }
 0x215   : > { %v2750_v32 = vadd.f32 %v3467_v29, %v2710_v28 }
 0x22f   : > { %v3487_v33 = vpop.f32.mrb[24].mxu0 }
 0x230   : > { %v3488_v34 = vpop.f32.mrb[25].mxu0 }
 0x231   : > { %v3509_v35 = vpop.f32.mrb[24].mxu1  ;;  %v3489_v36 = vadd.f32 %v3488_v34, %v3487_v33  ;;  %v3490_v42 = vpop.f32.mrb[26].mxu0 }
 0x232   : > { %v3510_v37 = vpop.f32.mrb[25].mxu1  ;;  %v3491_v38 = vpop.f32.mrb[27].mxu0 }
 0x233   : > { %v2790_v39 = vadd.f32 %v3489_v36, %v2750_v32  ;;  %v3511_v40 = vadd.f32 %v3510_v37, %v3509_v35  ;;  %v3512_v41 = vpop.f32.mrb[26].mxu1  ;;  %2840 = sbr.rel (%p3199_p9) target bundleno = 580 (0x244), region = 52 }
 0x234   : > { %v3513_v44 = vpop.f32.mrb[27].mxu1 }
 0x235   : > { %v2830_v45 = vadd.f32 %v3511_v40, %v2790_v39 }
 0x237   : > { %v2835_v46 = vadd.f32 %v2830_v45, %v275_v43 }
 0x239   : > { %2836 = vst [vmem:[#allocation2] sm:$0x3] %v2835_v46 }
 0x240   : > { %v2841_v47 = vld [vmem:[#allocation2] sm:$0x3] }
 0x241   : > { %v2849_v49 = vadd.f32 %v3200_v48, %v2841_v47 }
 0x243   : > { %2850 = vst [vmem:[#allocation9] sm:$0x3] %v2849_v49 }
 0x244 PF: > { %p3545_p11 = scmp.eq.s32.totalorder %s4063_s18, 6  ;;  %s4013_s20 = smov [#allocation9]  }
 0x245   : > { %s2861_s21 = sshll.u32 %s4013_s20, 4  ;;  %s2862_s21 = int_to_ptr.vmem [resolvable:$true] %s2861_s21 }
 0x246   : > { %s3916_s28 = scalar_lea.vmem %s2862_s21, 32  ;;  %p3923_p1 = scmp.lt.s32.totalorder %s2862_s21, %s2862_s21 }
 0x247   : > { %p3917_p13 = scmp.ne.s32.totalorder %s2862_s21, %s3916_s28  ;;  %p3924_p0 = scmp.lt.s32.totalorder %s3916_s28, %s3916_s28 }
 0x249   : > { %p3918_p3 = pnand %p3917_p13, %p3545_p11  ;;  %p3925_p8 = por %p3924_p0, %p3923_p1 }
 0x24b   : > { %p3919_p4 = pneg %p3918_p3 }
 0x24d   : > { %p3926_p2 = pnand %p3925_p8, %p3919_p4 }
 0x24f   : > { %3929 = shalt.err (!%p3926_p2)
}
 0x250   : > { %s3930_s8 = scalar_lea.hbm %s4548_s3, 32 }
 0x251   : > { %p3931_p12 = scmp.ne.s32.totalorder %s4548_s3, %s3930_s8  ;;  %p3936_p5 = scmp.lt.u32.totalorder %s3930_s8, %s4548_s3 }
 0x253   : > { %p3932_p7 = pnand %p3931_p12, %p3545_p11 }
 0x255   : > { %p3933_p10 = pneg %p3932_p7 }
 0x257   : > { %p3938_p6 = pnand %p3936_p5, %p3933_p10 }
 0x259   : > { %3941 = shalt.err (!%p3938_p6)
}
 0x25a   : > { %3528 = dma.vmem_to_hbm [thread:$0]  (%p3545_p11), %s2862_s21, 32, %s4548_s3, [#allocation5]  }
 0x25b   : > { %3979 = dma.done.wait (%p3545_p11), [#allocation5], 32  }
 0x25c   : > { %3981 = vsyncadd (%p3545_p11), [#allocation5], 4294967264 }
 0x25d PF: > { %s20_s17 = sadd.s32 1, %s4004_s17   ;;  %s4565_s12 = smov %s3988_s13 }
 0x25e   : > { %p17_p9 = scmp.ge.s32.totalorder %s20_s17, 9   ;;  %s4566_s13 = smov %s3992_s14 }
 0x25f   : > { %s4567_s14 = smov %s4147_s26  ;;  %s4568_s15 = smov %s4000_s16 }
 0x260   : > { %s4569_s16 = smov %s4571_s25  ;;  %19 = sbr.rel (!%p17_p9) target bundleno = 7 (0x7), region = 96 }
 0x267   :  { %2874 = vsyncpa [#allocation4], 1 }
 0x268   :  { %2876 = vsyncpa [#allocation4 + $0x1], 1 }
 0x269   :  { %2877 = vsyncpa [#allocation7], 1 }
 0x26a   :  { %2879 = vsyncpa [#allocation7 + $0x1], 1 }
 0x26b   :  { %2880 = vsyncpa [#allocation5], 1 }
 0x26c   :  { %2882 = vsyncpa [#allocation5 + $0x1], 1 }

</bundles_post_ra>
